<compile_context>
chip_gen: v6e
topology: v6e:2x2x1
jax: 0.10.0
libtpu: 0.0.40
codegen_flags: <defaults>
</compile_context>

<pallas_src>
import jax
import jax.numpy as jnp
from jax.experimental import pallas as pl
from jax.experimental.pallas import tpu as pltpu

LANE_HALF = 64  # each complex half pads to 64 lanes -> wpack is a multiple of 128


def _round_up(n, m):
    return ((n + m - 1) // m) * m


def _choose_tb(B, cap=1024):
    """Batch tile: >=2 grid steps when possible (v7x megacore), padding < 1 tile."""
    b8 = _round_up(max(B, 1), 8)
    tb = _round_up(b8 // 2 if b8 >= 16 else b8, 8)
    return max(8, min(cap, tb))


def _complex_net_kernel(x_ref, w0_ref, b0_ref, w1_ref, b1_ref,
                        w2_ref, b2_ref, w3_ref, b3_ref, o_ref):
    # x_ref : (TB, 2T)       interleaved re/im f32 activations   (tiled on batch)
    # w0    : (2T, WP) bf16  row-interleaved first ComplexLinear (resident)
    # w1,w2 : (WP, WP) bf16  packed [[Wr,Wi],[-Wi,Wr]] blocks    (resident)
    # w3    : (WP, 2T) bf16  column-interleaved last layer       (resident)
    # b*    : (1, WP)/(1,2T) f32 packed biases                   (resident)
    # o_ref : (TB, 2T)       interleaved re/im f32 output
    h = x_ref[...]
    # layer 0 + CReLU (ReLU on packed real/imag lanes)
    h = jnp.dot(h.astype(jnp.bfloat16), w0_ref[...],
                preferred_element_type=jnp.float32) + b0_ref[...]
    h = jnp.maximum(h, 0.0)
    # layer 1 + CReLU
    h = jnp.dot(h.astype(jnp.bfloat16), w1_ref[...],
                preferred_element_type=jnp.float32) + b1_ref[...]
    h = jnp.maximum(h, 0.0)
    # layer 2 + CReLU
    h = jnp.dot(h.astype(jnp.bfloat16), w2_ref[...],
                preferred_element_type=jnp.float32) + b2_ref[...]
    h = jnp.maximum(h, 0.0)
    # layer 3, no activation (matches forward())
    o_ref[...] = (jnp.dot(h.astype(jnp.bfloat16), w3_ref[...],
                          preferred_element_type=jnp.float32)
                  + b3_ref[...]).astype(o_ref.dtype)


def complex_net_forward(x, params, *, tb=None):
    """x: (B, t_input) complex64. params: dict from init_params()."""
    B, T = x.shape
    tin2 = 2 * T
    w0 = params["w0"]
    assert w0.shape[0] == tin2 and params["w3"].shape[1] == tin2, \
        "params were initialized for a different t_input"

    if tb is None:
        tb = _choose_tb(B)
    b_pad = _round_up(B, tb)

    # complex64 -> interleaved f32 rows [re0, im0, re1, im1, ...]; only narrow
    # (B, 2T) data touches HBM — no 128-wide zero-padded slab anymore.
    xi = jnp.stack([jnp.real(x), jnp.imag(x)], axis=-1).astype(jnp.float32)
    xi = xi.reshape(B, tin2)
    if b_pad != B:
        xi = jnp.pad(xi, ((0, b_pad - B), (0, 0)))

    def resident(shape):
        return pl.BlockSpec(shape, lambda i: (0,) * len(shape))

    out = pl.pallas_call(
        _complex_net_kernel,
        out_shape=jax.ShapeDtypeStruct((b_pad, tin2), jnp.float32),
        grid=(b_pad // tb,),
        in_specs=[
            pl.BlockSpec((tb, tin2), lambda i: (i, 0)),      # activations: tiled
            resident(params["w0"].shape), resident(params["b0"].shape),
            resident(params["w1"].shape), resident(params["b1"].shape),
            resident(params["w2"].shape), resident(params["b2"].shape),
            resident(params["w3"].shape), resident(params["b3"].shape),
        ],
        out_specs=pl.BlockSpec((tb, tin2), lambda i: (i, 0)),
        compiler_params=pltpu.CompilerParams(
            dimension_semantics=("parallel",),   # shard batch tiles on v7x's 2 TCs
        ),
    )(xi, params["w0"], params["b0"], params["w1"], params["b1"],
      params["w2"], params["b2"], params["w3"], params["b3"])

    # Interleaved output -> complex64, drop batch padding.
    out = out[:B].reshape(B, T, 2)
    return jax.lax.complex(out[..., 0], out[..., 1])


def init_params(key, t_input, M=10, H=5):
    """ComplexLinear params (PyTorch-style uniform init). Weights are (in, out):
    y = x @ W + b. Stored both per-layer (for the complex reference) and in the
    packed real block-matrix layout used by the kernel (bf16 weights)."""
    dims = [(t_input, M), (M, H), (H, M), (M, t_input)]
    f_pad = _round_up(max(t_input, M, H), LANE_HALF)   # 64 for these sizes
    wpack = 2 * f_pad

    ks = jax.random.split(key, 4 * len(dims))
    layers = []
    for k, (fi, fo) in enumerate(dims):
        bound = 1.0 / (fi ** 0.5)
        kwr, kwi, kbr, kbi = ks[4 * k:4 * k + 4]
        wr = jax.random.uniform(kwr, (fi, fo), jnp.float32, -bound, bound)
        wi = jax.random.uniform(kwi, (fi, fo), jnp.float32, -bound, bound)
        br = jax.random.uniform(kbr, (fo,), jnp.float32, -bound, bound)
        bi = jax.random.uniform(kbi, (fo,), jnp.float32, -bound, bound)
        layers.append((wr, wi, br, bi))

    def block(wr, wi, fi, fo):
        # [x_r | x_i] @ [[Wr, Wi], [-Wi, Wr]] = [x_r Wr - x_i Wi | x_r Wi + x_i Wr]
        w = jnp.zeros((wpack, wpack), jnp.float32)
        w = w.at[:fi, :fo].set(wr)
        w = w.at[:fi, f_pad:f_pad + fo].set(wi)
        w = w.at[f_pad:f_pad + fi, :fo].set(-wi)
        w = w.at[f_pad:f_pad + fi, f_pad:f_pad + fo].set(wr)
        return w

    def bias(br, bi, fo):
        b = jnp.zeros((1, wpack), jnp.float32)
        return b.at[0, :fo].set(br).at[0, f_pad:f_pad + fo].set(bi)

    # Layer 0: rows permuted to the interleaved [re, im, re, im, ...] input order.
    wr, wi, br, bi = layers[0]
    fi, fo = dims[0]
    full0 = block(wr, wi, fi, fo)
    w0 = jnp.stack([full0[:fi], full0[f_pad:f_pad + fi]], axis=1).reshape(2 * fi, wpack)
    b0 = bias(br, bi, fo)

    # Layers 1, 2: standard packed block matrices.
    wr, wi, br, bi = layers[1]
    fi, fo = dims[1]
    w1, b1 = block(wr, wi, fi, fo), bias(br, bi, fo)
    wr, wi, br, bi = layers[2]
    fi, fo = dims[2]
    w2, b2 = block(wr, wi, fi, fo), bias(br, bi, fo)

    # Layer 3: columns permuted to interleaved output order; padded cols dropped.
    wr, wi, br, bi = layers[3]
    fi, fo = dims[3]
    full3 = block(wr, wi, fi, fo)
    w3 = jnp.stack([full3[:, :fo], full3[:, f_pad:f_pad + fo]], axis=-1).reshape(wpack, 2 * fo)
    b3 = jnp.stack([br, bi], axis=-1).reshape(1, 2 * fo)

    bf16 = lambda w: w.astype(jnp.bfloat16)
    return {"w0": bf16(w0), "b0": b0, "w1": bf16(w1), "b1": b1,
            "w2": bf16(w2), "b2": b2, "w3": bf16(w3), "b3": b3,
            "layers": layers}


def reference_forward(x, params):
    """Pure-JAX complex (f32) reference of ComplexNet.forward with CReLU."""
    crelu = lambda z: (jnp.maximum(jnp.real(z), 0.0)
                       + 1j * jnp.maximum(jnp.imag(z), 0.0))

    def clin(z, layer):
        wr, wi, br, bi = layer
        return jnp.matmul(z, wr + 1j * wi) + (br + 1j * bi)

    l = params["layers"]
    m = crelu(clin(x, l[0]))       # transform_lin_layer + activation
    h = crelu(clin(m, l[1]))       # transform_hidden_layer + activation
    m = crelu(clin(h, l[2]))       # inverse_hidden_layer + activation
    return clin(m, l[3])           # inverse_lin_layer (no activation)


if __name__ == "__main__":
    key = jax.random.PRNGKey(0)
    k_xr, k_xi, k_p = jax.random.split(key, 3)

    B, T_INPUT, M, H = 8, 16, 10, 5
    x = (jax.random.normal(k_xr, (B, T_INPUT), jnp.float32)
         + 1j * jax.random.normal(k_xi, (B, T_INPUT), jnp.float32)).astype(jnp.complex64)
    params = init_params(k_p, T_INPUT, M=M, H=H)

    out = jax.block_until_ready(complex_net_forward(x, params))
    ref = reference_forward(x, params)

    assert out.shape == (B, T_INPUT)
    assert out.dtype == jnp.complex64
    # bf16 MXU operands -> compare at bf16-level tolerance; any structural /
    # layout bug (sign, permutation, padding leak) would show up as O(1) error.
    assert jnp.allclose(out, ref, atol=5e-2, rtol=5e-2), "mismatch vs complex reference"

    print("KERNEL_OK")
</pallas_src>

<mosaic_0001>
module attributes {stable_mosaic.version = 11 : i64} {
  func.func @_complex_net_kernel(%arg0: i32, %arg1: memref<8x32xf32, #tpu.memory_space<vmem>>, %arg2: memref<32x128xbf16, #tpu.memory_space<vmem>>, %arg3: memref<1x128xf32, #tpu.memory_space<vmem>>, %arg4: memref<128x128xbf16, #tpu.memory_space<vmem>>, %arg5: memref<1x128xf32, #tpu.memory_space<vmem>>, %arg6: memref<128x128xbf16, #tpu.memory_space<vmem>>, %arg7: memref<1x128xf32, #tpu.memory_space<vmem>>, %arg8: memref<128x32xbf16, #tpu.memory_space<vmem>>, %arg9: memref<1x32xf32, #tpu.memory_space<vmem>>, %arg10: memref<8x32xf32, #tpu.memory_space<vmem>>) attributes {dimension_semantics = [#tpu.dimension_semantics<parallel>], iteration_bounds = array<i64: 1>, scalar_prefetch = 0 : i64, scratch_operands = 0 : i64, tpu.core_type = #tpu.core_type<tc>, window_params = [{transform_indices = @transform_0, window_bounds = array<i64: 8, 32>}, {pipeline_mode = #tpu.pipeline_mode<synchronous>, transform_indices = @transform_1, window_bounds = array<i64: 32, 128>}, {pipeline_mode = #tpu.pipeline_mode<synchronous>, transform_indices = @transform_2, window_bounds = array<i64: 1, 128>}, {pipeline_mode = #tpu.pipeline_mode<synchronous>, transform_indices = @transform_3, window_bounds = array<i64: 128, 128>}, {pipeline_mode = #tpu.pipeline_mode<synchronous>, transform_indices = @transform_4, window_bounds = array<i64: 1, 128>}, {pipeline_mode = #tpu.pipeline_mode<synchronous>, transform_indices = @transform_5, window_bounds = array<i64: 128, 128>}, {pipeline_mode = #tpu.pipeline_mode<synchronous>, transform_indices = @transform_6, window_bounds = array<i64: 1, 128>}, {pipeline_mode = #tpu.pipeline_mode<synchronous>, transform_indices = @transform_7, window_bounds = array<i64: 128, 32>}, {pipeline_mode = #tpu.pipeline_mode<synchronous>, transform_indices = @transform_8, window_bounds = array<i64: 1, 32>}, {transform_indices = @transform_9, window_bounds = array<i64: 8, 32>}]} {
    %c0 = arith.constant 0 : index
    %c0_0 = arith.constant 0 : index
    %0 = vector.load %arg1[%c0, %c0_0] : memref<8x32xf32, #tpu.memory_space<vmem>>, vector<8x32xf32>
    %1 = arith.truncf %0 : vector<8x32xf32> to vector<8x32xbf16>
    %c0_1 = arith.constant 0 : index
    %c0_2 = arith.constant 0 : index
    %2 = vector.load %arg2[%c0_1, %c0_2] : memref<32x128xbf16, #tpu.memory_space<vmem>>, vector<32x128xbf16>
    %cst = arith.constant dense<0.000000e+00> : vector<8x128xf32>
    %3 = tpu.matmul %1, %2, %cst {dimension_numbers = #tpu.dot_dimension_numbers<[1], [0], [0], [1], [0, 0, 1, 1], [], []>} : vector<8x32xbf16>, vector<32x128xbf16>, vector<8x128xf32> -> vector<8x128xf32>
    %c0_3 = arith.constant 0 : index
    %c0_4 = arith.constant 0 : index
    %4 = vector.load %arg3[%c0_3, %c0_4] : memref<1x128xf32, #tpu.memory_space<vmem>>, vector<1x128xf32>
    %5 = vector.broadcast %4 : vector<1x128xf32> to vector<8x128xf32>
    %6 = arith.addf %3, %5 : vector<8x128xf32>
    %cst_5 = arith.constant 0.000000e+00 : f32
    %7 = vector.broadcast %cst_5 : f32 to vector<8x128xf32>
    %8 = arith.maximumf %6, %7 : vector<8x128xf32>
    %9 = arith.truncf %8 : vector<8x128xf32> to vector<8x128xbf16>
    %c0_6 = arith.constant 0 : index
    %c0_7 = arith.constant 0 : index
    %10 = vector.load %arg4[%c0_6, %c0_7] : memref<128x128xbf16, #tpu.memory_space<vmem>>, vector<128x128xbf16>
    %cst_8 = arith.constant dense<0.000000e+00> : vector<8x128xf32>
    %11 = tpu.matmul %9, %10, %cst_8 {dimension_numbers = #tpu.dot_dimension_numbers<[1], [0], [0], [1], [0, 0, 1, 1], [], []>} : vector<8x128xbf16>, vector<128x128xbf16>, vector<8x128xf32> -> vector<8x128xf32>
    %c0_9 = arith.constant 0 : index
    %c0_10 = arith.constant 0 : index
    %12 = vector.load %arg5[%c0_9, %c0_10] : memref<1x128xf32, #tpu.memory_space<vmem>>, vector<1x128xf32>
    %13 = vector.broadcast %12 : vector<1x128xf32> to vector<8x128xf32>
    %14 = arith.addf %11, %13 : vector<8x128xf32>
    %cst_11 = arith.constant 0.000000e+00 : f32
    %15 = vector.broadcast %cst_11 : f32 to vector<8x128xf32>
    %16 = arith.maximumf %14, %15 : vector<8x128xf32>
    %17 = arith.truncf %16 : vector<8x128xf32> to vector<8x128xbf16>
    %c0_12 = arith.constant 0 : index
    %c0_13 = arith.constant 0 : index
    %18 = vector.load %arg6[%c0_12, %c0_13] : memref<128x128xbf16, #tpu.memory_space<vmem>>, vector<128x128xbf16>
    %cst_14 = arith.constant dense<0.000000e+00> : vector<8x128xf32>
    %19 = tpu.matmul %17, %18, %cst_14 {dimension_numbers = #tpu.dot_dimension_numbers<[1], [0], [0], [1], [0, 0, 1, 1], [], []>} : vector<8x128xbf16>, vector<128x128xbf16>, vector<8x128xf32> -> vector<8x128xf32>
    %c0_15 = arith.constant 0 : index
    %c0_16 = arith.constant 0 : index
    %20 = vector.load %arg7[%c0_15, %c0_16] : memref<1x128xf32, #tpu.memory_space<vmem>>, vector<1x128xf32>
    %21 = vector.broadcast %20 : vector<1x128xf32> to vector<8x128xf32>
    %22 = arith.addf %19, %21 : vector<8x128xf32>
    %cst_17 = arith.constant 0.000000e+00 : f32
    %23 = vector.broadcast %cst_17 : f32 to vector<8x128xf32>
    %24 = arith.maximumf %22, %23 : vector<8x128xf32>
    %25 = arith.truncf %24 : vector<8x128xf32> to vector<8x128xbf16>
    %c0_18 = arith.constant 0 : index
    %c0_19 = arith.constant 0 : index
    %26 = vector.load %arg8[%c0_18, %c0_19] : memref<128x32xbf16, #tpu.memory_space<vmem>>, vector<128x32xbf16>
    %cst_20 = arith.constant dense<0.000000e+00> : vector<8x32xf32>
    %27 = tpu.matmul %25, %26, %cst_20 {dimension_numbers = #tpu.dot_dimension_numbers<[1], [0], [0], [1], [0, 0, 1, 1], [], []>} : vector<8x128xbf16>, vector<128x32xbf16>, vector<8x32xf32> -> vector<8x32xf32>
    %c0_21 = arith.constant 0 : index
    %c0_22 = arith.constant 0 : index
    %28 = vector.load %arg9[%c0_21, %c0_22] : memref<1x32xf32, #tpu.memory_space<vmem>>, vector<1x32xf32>
    %29 = vector.broadcast %28 : vector<1x32xf32> to vector<8x32xf32>
    %30 = arith.addf %27, %29 : vector<8x32xf32>
    %c0_23 = arith.constant 0 : index
    %c0_24 = arith.constant 0 : index
    %31 = vector.load %arg10[%c0_23, %c0_24] : memref<8x32xf32, #tpu.memory_space<vmem>>, vector<8x32xf32>
    tpu.vector_store %arg10[%c0_23, %c0_24], %30 {strides = array<i32>} : memref<8x32xf32, #tpu.memory_space<vmem>>, vector<8x32xf32>,
    return
  }
  func.func @transform_0(%arg0: i32) -> (i32, i32) {
    %c0_i32 = arith.constant 0 : i32
    %c0_i32_0 = arith.constant 0 : i32
    return %arg0, %c0_i32 : i32, i32
  }
  func.func @transform_1(%arg0: i32) -> (i32, i32) {
    %c0_i32 = arith.constant 0 : i32
    %c0_i32_0 = arith.constant 0 : i32
    %c0_i32_1 = arith.constant 0 : i32
    return %c0_i32, %c0_i32_0 : i32, i32
  }
  func.func @transform_2(%arg0: i32) -> (i32, i32) {
    %c0_i32 = arith.constant 0 : i32
    %c0_i32_0 = arith.constant 0 : i32
    %c0_i32_1 = arith.constant 0 : i32
    return %c0_i32, %c0_i32_0 : i32, i32
  }
  func.func @transform_3(%arg0: i32) -> (i32, i32) {
    %c0_i32 = arith.constant 0 : i32
    %c0_i32_0 = arith.constant 0 : i32
    %c0_i32_1 = arith.constant 0 : i32
    return %c0_i32, %c0_i32_0 : i32, i32
  }
  func.func @transform_4(%arg0: i32) -> (i32, i32) {
    %c0_i32 = arith.constant 0 : i32
    %c0_i32_0 = arith.constant 0 : i32
    %c0_i32_1 = arith.constant 0 : i32
    return %c0_i32, %c0_i32_0 : i32, i32
  }
  func.func @transform_5(%arg0: i32) -> (i32, i32) {
    %c0_i32 = arith.constant 0 : i32
    %c0_i32_0 = arith.constant 0 : i32
    %c0_i32_1 = arith.constant 0 : i32
    return %c0_i32, %c0_i32_0 : i32, i32
  }
  func.func @transform_6(%arg0: i32) -> (i32, i32) {
    %c0_i32 = arith.constant 0 : i32
    %c0_i32_0 = arith.constant 0 : i32
    %c0_i32_1 = arith.constant 0 : i32
    return %c0_i32, %c0_i32_0 : i32, i32
  }
  func.func @transform_7(%arg0: i32) -> (i32, i32) {
    %c0_i32 = arith.constant 0 : i32
    %c0_i32_0 = arith.constant 0 : i32
    %c0_i32_1 = arith.constant 0 : i32
    return %c0_i32, %c0_i32_0 : i32, i32
  }
  func.func @transform_8(%arg0: i32) -> (i32, i32) {
    %c0_i32 = arith.constant 0 : i32
    %c0_i32_0 = arith.constant 0 : i32
    %c0_i32_1 = arith.constant 0 : i32
    return %c0_i32, %c0_i32_0 : i32, i32
  }
  func.func @transform_9(%arg0: i32) -> (i32, i32) {
    %c0_i32 = arith.constant 0 : i32
    %c0_i32_0 = arith.constant 0 : i32
    return %arg0, %c0_i32 : i32, i32
  }
}

</mosaic_0001>

<bundles_post_ra>
// kernel: tpu_custom_call.1
= control target key start
LH: loop header
LB: loop body
LE: loop exit
PB: predicated region body
PF: predicated region fallthrough
CT: control target
= control target key end

     0   :  { %14 = vsyncpa [#allocation3], 0  ;;  %s881_s0 = inlined_call_operand.hbm [shape: f32[8,32], index: 0, kind: input, shape index: {}]   ;;  %s882_s1 = inlined_call_operand.vmem [shape: bf16[32,128], index: 1, kind: input, shape index: {}]   ;;  %s883_s2 = inlined_call_operand.vmem [shape: f32[1,128], index: 2, kind: input, shape index: {}]   ;;  %s884_s3 = inlined_call_operand.vmem [shape: bf16[128,128], index: 3, kind: input, shape index: {}]   ;;  %s885_s4 = inlined_call_operand.vmem [shape: f32[1,128], index: 4, kind: input, shape index: {}]   ;;  %s886_s5 = inlined_call_operand.hbm [shape: bf16[128,128], index: 5, kind: input, shape index: {}]   ;;  %s887_s6 = inlined_call_operand.vmem [shape: f32[1,128], index: 6, kind: input, shape index: {}]   ;;  %s888_s7 = inlined_call_operand.vmem [shape: bf16[128,32], index: 7, kind: input, shape index: {}]   ;;  %s889_s8 = inlined_call_operand.vmem [shape: f32[1,32], index: 8, kind: input, shape index: {}]   ;;  %s890_s9 = inlined_call_operand.hbm [shape: f32[8,32], index: 9, kind: output, shape index: {}]  }
   0x1   :  { %15 = vsyncpa [#allocation6], 0 }
   0x2   :  { %16 = vsyncpa [#allocation4], 0  ;;  %s713_s30 = smov [#allocation2]   ;;  %s714_s11 = smov [#allocation5]  }
   0x3   :  { %s23_s10 = sshll.u32 %s713_s30, 4  ;;  %s40_s12 = sshll.u32 %s714_s11, 4  ;;  %s24_s10 = int_to_ptr.vmem [resolvable:$true] %s23_s10  ;;  %s41_s12 = int_to_ptr.vmem [resolvable:$true] %s40_s12 }
   0x4   :  { %s655_s13 = scalar_lea.vmem %s24_s10, 128  ;;  %p660_p1 = scmp.lt.s32.totalorder %s24_s10, %s24_s10 }
   0x5   :  { %p656_p0 = scmp.ne.s32.totalorder %s24_s10, %s655_s13  ;;  %p661_p2 = scmp.lt.s32.totalorder %s655_s13, %s655_s13 }
   0x7   :  { %p662_p3 = por %p661_p2, %p660_p1 }
   0x9   :  { %p663_p4 = pnand %p662_p3, %p656_p0 }
   0xb   :  { %666 = shalt.err (!%p663_p4)
}
   0xc   :  { %26 = dma.hbm_to_vmem [thread:$0]  %s881_s0, 128, %s24_s10, [#allocation3]  }
   0xd   :  { %s675_s16 = scalar_lea.vmem %s41_s12, 1024  ;;  %p680_p6 = scmp.lt.s32.totalorder %s41_s12, %s41_s12 }
   0xe   :  { %p676_p5 = scmp.ne.s32.totalorder %s41_s12, %s675_s16  ;;  %p681_p7 = scmp.lt.s32.totalorder %s675_s16, %s675_s16 }
  0x10   :  { %p682_p8 = por %p681_p7, %p680_p6 }
  0x12   :  { %p683_p9 = pnand %p682_p8, %p676_p5 }
  0x14   :  { %686 = shalt.err (!%p683_p9)
}
  0x15   :  { %s715_s17 = smov 64   ;;  %s716_s18 = smov 4  }
  0x16   :  { %46 = dma.hbm_to_vmem [thread:$0]  %s886_s5, 1024, %s41_s12, [#allocation6], %s715_s17, %s715_s17, %s716_s18  }
  0x17   :  { %707 = dma.done.wait [#allocation3], 128  }
  0x18   :  { %708 = vsyncadd [#allocation3], 4294967168 }
  0x19   :  { %709 = dma.done.wait [#allocation6], 1024  }
  0x1a   :  { %710 = vsyncadd [#allocation6], 4294966272  ;;  %v717_v0 = vmov 0.0   ;;  %vm718_vm0 = vmmov 0   ;;  %v621_v1 = vld [vmem:[%s882_s1 + $0x8] sm:$0xff]   ;;  %v622_v2 = vld [vmem:[%s882_s1] sm:$0xff]  }
  0x1b   :  { %546 = vmatprep.subr.bf16.mxu0 %v717_v0  ;;  %550 = vmatprep.mubr.msk.bf16.mxu0 %vm718_vm0, %v717_v0  ;;  %v60_v3 = vld [vmem:[#allocation2] sm:$0xff]  ;;  %v623_v4 = vld [vmem:[%s884_s3 + $0x38] sm:$0xff]   ;;  %v624_v6 = vld [vmem:[%s884_s3 + $0x30] sm:$0xff]   ;;  %vm85_vm1 = vcmask 261120   ;;  %s719_s14 = smov [#allocation7]  }
  0x1c   :  { %554 = vmatprep.subr.bf16.mxu1 %v717_v0  ;;  %570 = vmatprep.mubr.msk.bf16.mxu1 %vm718_vm0, %v717_v0  ;;  %v61_v5 = vpack.c.bf16 %v60_v3, %v60_v3  ;;  %v625_v7 = vld [vmem:[%s884_s3 + $0x28] sm:$0xff]   ;;  %v626_v8 = vld [vmem:[%s884_s3 + $0x20] sm:$0xff]   ;;  %v627_v9 = vld [vmem:[%s884_s3 + $0x18] sm:$0xff]   ;;  %s475_s15 = sshll.u32 %s719_s14, 4  ;;  %s476_s15 = int_to_ptr.vmem [resolvable:$true] %s475_s15 }
  0x1d   :  { %547 = vmatpush3.bf16.msra.mxu0 %v621_v1  ;;  %555 = vmatpush3.bf16.msra.mxu1 %v623_v4  ;;  %v628_v10 = vld [vmem:[%s884_s3 + $0x10] sm:$0xff]   ;;  %v629_v11 = vld [vmem:[%s884_s3 + $0x8] sm:$0xff]   ;;  %v630_v12 = vld [vmem:[%s884_s3] sm:$0xff]   ;;  %p692_p11 = scmp.lt.s32.totalorder %s476_s15, %s476_s15 }
  0x1e   :  { %548 = vmatprep.subr.bf16.mxu0 %v717_v0  ;;  %556 = vmatprep.subr.bf16.mxu1 %v717_v0  ;;  %v631_v13 = vld [vmem:[#allocation5 + $0x38] sm:$0xff]   ;;  %v632_v14 = vld [vmem:[#allocation5 + $0x30] sm:$0xff]   ;;  %v633_v15 = vld [vmem:[#allocation5 + $0x28] sm:$0xff]  }
  0x1f   :  { %v634_v16 = vld [vmem:[#allocation5 + $0x20] sm:$0xff]   ;;  %v635_v17 = vld [vmem:[#allocation5 + $0x18] sm:$0xff]   ;;  %v636_v18 = vld [vmem:[#allocation5 + $0x10] sm:$0xff]  }
  0x20   :  { %v485_v19 = vld [vmem:[%s883_s2] ss:$0 sm:$0xff]  ;;  %v637_v27 = vld [vmem:[#allocation5 + $0x8] sm:$0xff]   ;;  %v638_v28 = vld [vmem:[#allocation5] sm:$0xff]  }
  0x21   :  { %549 = vmatpush3.bf16.msra.mxu0 %v622_v2  ;;  %557 = vmatpush3.bf16.msra.mxu1 %v624_v6  ;;  %v639_v29 = vld [vmem:[%s888_s7 + $0x38] sm:$0xff]   ;;  %v640_v30 = vld [vmem:[%s888_s7 + $0x30] sm:$0xff]   ;;  %v641_v31 = vld [vmem:[%s888_s7 + $0x28] sm:$0xff]  }
  0x22   :  { %574 = vmatprep.subr.bf16.mxu0 %v717_v0  ;;  %558 = vmatprep.subr.bf16.mxu1 %v717_v0  ;;  %v642_v32 = vld [vmem:[%s888_s7 + $0x20] sm:$0xff]   ;;  %v643_v33 = vld [vmem:[%s888_s7 + $0x18] sm:$0xff]   ;;  %v644_v34 = vld [vmem:[%s888_s7 + $0x10] sm:$0xff]  }
  0x23   :  { %v489_v35 = vld [vmem:[%s885_s4] ss:$0 sm:$0xff]  ;;  %v645_v43 = vld [vmem:[%s888_s7 + $0x8] sm:$0xff]  }
  0x24   :  { %551 = vmatmul.mubr.msk.bf16.vlgmr.msra.gmra.mxu0 %vm85_vm1, %v61_v5  ;;  %v646_v44 = vld [vmem:[%s888_s7] sm:$0xff]  }
  0x25   :  { %590 = vmatprep.mubr.msk.bf16.mxu0 %vm718_vm0, %v717_v0  ;;  %559 = vmatpush3.bf16.msra.mxu1 %v625_v7  ;;  %v498_v45 = vld [vmem:[%s887_s6] ss:$0 sm:$0xff]  ;;  %s687_s6 = scalar_lea.vmem %s476_s15, 128 }
  0x26   :  { %560 = vmatprep.subr.bf16.mxu1 %v717_v0  ;;  %575 = vmatpush3.bf16.msra.mxu0 %v631_v13  ;;  %v507_v53 = vld [vmem:[%s889_s8] ss:$0 sm:$0xff]  ;;  %p688_p10 = scmp.ne.s32.totalorder %s476_s15, %s687_s6  ;;  %p693_p12 = scmp.lt.s32.totalorder %s687_s6, %s687_s6 }
  0x27   :  { %576 = vmatprep.subr.bf16.mxu0 %v717_v0 }
  0x28   :  { %p694_p13 = por %p693_p12, %p692_p11 }
  0x29   :  { %561 = vmatpush3.bf16.msra.mxu1 %v626_v8 }
  0x2a   :  { %562 = vmatprep.subr.bf16.mxu1 %v717_v0  ;;  %577 = vmatpush3.bf16.msra.mxu0 %v632_v14  ;;  %p695_p0 = pnand %p694_p13, %p688_p10 }
  0x2b   :  { %578 = vmatprep.subr.bf16.mxu0 %v717_v0 }
  0x2d   :  { %563 = vmatpush3.bf16.msra.mxu1 %v627_v9 }
  0x2e   :  { %564 = vmatprep.subr.bf16.mxu1 %v717_v0  ;;  %579 = vmatpush3.bf16.msra.mxu0 %v633_v15 }
  0x2f   :  { %580 = vmatprep.subr.bf16.mxu0 %v717_v0 }
  0x31   :  { %565 = vmatpush3.bf16.msra.mxu1 %v628_v10 }
  0x32   :  { %566 = vmatprep.subr.bf16.mxu1 %v717_v0  ;;  %581 = vmatpush3.bf16.msra.mxu0 %v634_v16 }
  0x33   :  { %582 = vmatprep.subr.bf16.mxu0 %v717_v0 }
  0x35   :  { %567 = vmatpush3.bf16.msra.mxu1 %v629_v11 }
  0x36   :  { %568 = vmatprep.subr.bf16.mxu1 %v717_v0  ;;  %583 = vmatpush3.bf16.msra.mxu0 %v635_v17 }
  0x37   :  { %584 = vmatprep.subr.bf16.mxu0 %v717_v0 }
  0x39   :  { %569 = vmatpush3.bf16.msra.mxu1 %v630_v12 }
  0x3a   :  { %594 = vmatprep.subr.bf16.mxu1 %v717_v0  ;;  %585 = vmatpush3.bf16.msra.mxu0 %v636_v18 }
  0x3b   :  { %586 = vmatprep.subr.bf16.mxu0 %v717_v0 }
  0x3e   :  { %587 = vmatpush3.bf16.msra.mxu0 %v637_v27 }
  0x3f   :  { %588 = vmatprep.subr.bf16.mxu0 %v717_v0 }
  0x42   :  { %589 = vmatpush3.bf16.msra.mxu0 %v638_v28 }
  0xe4   :  { %v123_v20 = vpop.f32.mrf.mxu0 }
  0xe5   :  { %v124_v21 = vadd.f32 %v485_v19, %v123_v20 }
  0xe6   :  { %v552_v22 = vpop.f32.mrf.mxu0 }
  0xe7   :  { %v129_v23 = vmax.f32 %v124_v21, 0.0 }
  0xe8   :  { %v126_v24 = vpop.f32.mrf.mxu0 }
  0xe9   :  { %v130_v25 = vpack.c.bf16 %v129_v23, %v129_v23 }
  0xea   :  { %v553_v26 = vpop.f32.mrf.mxu0 }
  0xeb   :  { %571 = vmatmul.mubr.bf16.vlgmr.msra.gmra.mxu1 %v130_v25 }
  0xec   :  { %610 = vmatprep.mubr.msk.bf16.mxu1 %vm718_vm0, %v717_v0  ;;  %595 = vmatpush3.bf16.msra.mxu1 %v639_v29 }
  0xed   :  { %596 = vmatprep.subr.bf16.mxu1 %v717_v0 }
  0xf0   :  { %597 = vmatpush3.bf16.msra.mxu1 %v640_v30 }
  0xf1   :  { %598 = vmatprep.subr.bf16.mxu1 %v717_v0 }
  0xf4   :  { %599 = vmatpush3.bf16.msra.mxu1 %v641_v31 }
  0xf5   :  { %600 = vmatprep.subr.bf16.mxu1 %v717_v0 }
  0xf8   :  { %601 = vmatpush3.bf16.msra.mxu1 %v642_v32 }
  0xf9   :  { %602 = vmatprep.subr.bf16.mxu1 %v717_v0 }
  0xfc   :  { %603 = vmatpush3.bf16.msra.mxu1 %v643_v33 }
  0xfd   :  { %604 = vmatprep.subr.bf16.mxu1 %v717_v0 }
 0x100   :  { %605 = vmatpush3.bf16.msra.mxu1 %v644_v34 }
 0x101   :  { %606 = vmatprep.subr.bf16.mxu1 %v717_v0 }
 0x104   :  { %607 = vmatpush3.bf16.msra.mxu1 %v645_v43 }
 0x105   :  { %608 = vmatprep.subr.bf16.mxu1 %v717_v0 }
 0x108   :  { %609 = vmatpush3.bf16.msra.mxu1 %v646_v44 }
 0x1ab   :  { %v236_v36 = vpop.f32.mrf.mxu1 }
 0x1ac   :  { %v237_v37 = vadd.f32 %v489_v35, %v236_v36 }
 0x1ad   :  { %v572_v38 = vpop.f32.mrf.mxu1 }
 0x1ae   :  { %v242_v39 = vmax.f32 %v237_v37, 0.0 }
 0x1af   :  { %v239_v40 = vpop.f32.mrf.mxu1 }
 0x1b0   :  { %v243_v41 = vpack.c.bf16 %v242_v39, %v242_v39 }
 0x1b1   :  { %v573_v42 = vpop.f32.mrf.mxu1 }
 0x1b2   :  { %591 = vmatmul.mubr.bf16.vlgmr.msra.gmra.mxu0 %v243_v41 }
 0x272   :  { %v349_v46 = vpop.f32.mrf.mxu0 }
 0x273   :  { %v350_v47 = vadd.f32 %v498_v45, %v349_v46 }
 0x274   :  { %v592_v48 = vpop.f32.mrf.mxu0 }
 0x275   :  { %v355_v49 = vmax.f32 %v350_v47, 0.0 }
 0x276   :  { %v352_v50 = vpop.f32.mrf.mxu0 }
 0x277   :  { %v356_v51 = vpack.c.bf16 %v355_v49, %v355_v49 }
 0x278   :  { %v593_v52 = vpop.f32.mrf.mxu0 }
 0x279   :  { %611 = vmatmul.mubr.bf16.vlgmr.msra.gmra.mxu1 %v356_v51 }
 0x339   :  { %v462_v54 = vpop.f32.mrf.mxu1 }
 0x33a   :  { %v463_v55 = vadd.f32 %v507_v53, %v462_v54 }
 0x33b   :  { %v612_v56 = vpop.f32.mrf.mxu1 }
 0x33c   :  { %468 = vst.msk [vmem:[#allocation7] sm:$0xff] %vm85_vm1, %v463_v55 }
 0x33d   :  { %v465_v57 = vpop.f32.mrf.mxu1 }
 0x33e   :  { %698 = shalt.err (!%p695_p0)
}
 0x33f   :  { %478 = dma.vmem_to_hbm [thread:$0]  %s476_s15, 128, %s890_s9, [#allocation4]   ;;  %v613_v58 = vpop.f32.mrf.mxu1 }
 0x340   :  { %711 = dma.done.wait [#allocation4], 128  }
 0x341   :  { %712 = vsyncadd [#allocation4], 4294967168 }
 0x342   :  { %482 = vsyncpa [#allocation3], 1 }
 0x343   :  { %483 = vsyncpa [#allocation6], 1 }
 0x344   :  { %484 = vsyncpa [#allocation4], 1 }

</bundles_post_ra>
